<compile_context>
chip_gen: v5e
topology: v5e:2x2
jax: 0.10.0
libtpu: 0.0.40
codegen_flags: <defaults>
</compile_context>

<pallas_src>
import jax
import jax.numpy as jnp
from jax import lax
from jax.experimental import pallas as pl
from jax.experimental.pallas import tpu as pltpu

# ---- module configuration (small, consistent with Bottleneck) -------------
N, H, W = 2, 8, 8
INPLANES = 16
PLANES = 4
EXPANSION = 4
GROUPS, BASE_WIDTH, DILATION, STRIDE = 1, 64, 1, 1
WIDTH = int(PLANES * (BASE_WIDTH / 64.0)) * GROUPS          # = 4
WPAD = ((WIDTH + 7) // 8) * 8                                # = 8 (sublane-aligned)
COUT = PLANES * EXPANSION                                    # = 16 == INPLANES
HW = H * W
M = N * HW                                                   # = 128 (one lane width)
EPS = 1e-5

assert (W & (W - 1)) == 0 and (H & (H - 1)) == 0, "bit-op index math assumes pow2 H, W"
LOG2_W = W.bit_length() - 1


def _bn_train_cm(h, gamma, beta):
    """BatchNorm2d training-mode forward on (C, M) data, fused scale/shift."""
    mu = jnp.mean(h, axis=1, keepdims=True)                  # (C, 1)
    d = h - mu
    var = jnp.mean(d * d, axis=1, keepdims=True)             # biased variance
    scale = gamma * lax.rsqrt(var + EPS)                     # rsqrt -> EUP (free slot)
    shift = beta - mu * scale
    return h * scale + shift


def bottleneck_kernel(x_ref, w1_ref, g1_ref, b1_ref,
                      w2_ref, g2_ref, b2_ref,
                      w3_ref, g3_ref, b3_ref, out_ref):
    # ---- merge batch halves onto lanes: (N, C, HW) -> (C, M=128) ----
    x = jnp.concatenate([x_ref[n] for n in range(N)], axis=-1)   # (INPLANES, M)

    # ---- conv1 (1x1) + bn1 + relu :  (WPAD, Cin) @ (Cin, M) -> (WPAD, M) ----
    h1 = jnp.dot(w1_ref[...], x, preferred_element_type=jnp.float32)
    h1 = jnp.maximum(_bn_train_cm(h1, g1_ref[...], b1_ref[...]), 0.0)

    # ---- conv2 (3x3, stride 1, pad 1) as ONE matmul over 9 packed taps ----
    # lane index r = n*HW + i*W + j ; recover i/j with bit ops (H, W pow2)
    r = lax.broadcasted_iota(jnp.int32, (1, M), 1)
    j = jnp.bitwise_and(r, W - 1)
    i = jnp.bitwise_and(jnp.right_shift(r, LOG2_W), H - 1)
    row_ok = {0: i >= 1, 1: None, 2: i <= H - 2}
    col_ok = {0: j >= 1, 1: None, 2: j <= W - 2}

    taps = []
    for di in range(3):
        for dj in range(3):
            s = (di - 1) * W + (dj - 1)                       # flat lane offset
            tap = h1 if s == 0 else pltpu.roll(h1, shift=(-s) % M, axis=1)
            rm, cm = row_ok[di], col_ok[dj]
            if rm is not None and cm is not None:
                mask = jnp.logical_and(rm, cm)
            else:
                mask = rm if rm is not None else cm
            if mask is not None:
                tap = jnp.where(mask, tap, 0.0)
            taps.append(tap)                                  # (WPAD, M), 8-aligned
    taps = jnp.concatenate(taps, axis=0)                      # (9*WPAD, M)

    acc = jnp.dot(w2_ref[...], taps, preferred_element_type=jnp.float32)  # (WPAD, M)
    h2 = jnp.maximum(_bn_train_cm(acc, g2_ref[...], b2_ref[...]), 0.0)

    # ---- conv3 (1x1) + bn3 + residual add + relu ----
    h3 = jnp.dot(w3_ref[...], h2, preferred_element_type=jnp.float32)     # (COUT, M)
    h3 = _bn_train_cm(h3, g3_ref[...], b3_ref[...])
    out = jnp.maximum(h3 + x, 0.0)      # downsample is None -> identity shortcut

    # ---- split lanes back into batch halves: (COUT, M) -> (N, COUT, HW) ----
    for n in range(N):
        out_ref[n] = out[:, n * HW:(n + 1) * HW]


def bottleneck_forward(x_nchw, params):
    x3 = x_nchw.reshape(N, INPLANES, HW)                 # free reshape, no transpose
    vmem = pl.BlockSpec(memory_space=pltpu.MemorySpace.VMEM)
    out3 = pl.pallas_call(
        bottleneck_kernel,
        out_shape=jax.ShapeDtypeStruct((N, COUT, HW), jnp.float32),
        in_specs=[vmem] * (1 + len(params)),
        out_specs=vmem,
    )(x3, *params)
    return out3.reshape(N, COUT, H, W)                   # free reshape back to NCHW


def pack_params(w1_t, w2_t, w3_t, g1, b1, g2, b2, g3, b3):
    """PyTorch OIHW weights / BN params -> kernel's transposed, WPAD-padded form."""
    w1p = jnp.zeros((WPAD, INPLANES), jnp.float32).at[:WIDTH].set(w1_t[:, :, 0, 0])
    # (Cout, Cin, 3, 3) -> (3, 3, WPAD, WPAD) padded -> (WPAD, 9*WPAD) tap-major
    w2_pad = jnp.zeros((3, 3, WPAD, WPAD), jnp.float32)
    w2_pad = w2_pad.at[:, :, :WIDTH, :WIDTH].set(jnp.transpose(w2_t, (2, 3, 0, 1)))
    w2p = jnp.transpose(w2_pad, (2, 0, 1, 3)).reshape(WPAD, 9 * WPAD)
    w3p = jnp.zeros((COUT, WPAD), jnp.float32).at[:, :WIDTH].set(w3_t[:, :, 0, 0])

    def pad_bn(g, b):
        gp = jnp.ones((WPAD,), jnp.float32).at[:WIDTH].set(g).reshape(WPAD, 1)
        bp = jnp.zeros((WPAD,), jnp.float32).at[:WIDTH].set(b).reshape(WPAD, 1)
        return gp, bp

    g1p, b1p = pad_bn(g1, b1)
    g2p, b2p = pad_bn(g2, b2)
    g3p, b3p = g3.reshape(COUT, 1), b3.reshape(COUT, 1)
    return (w1p, g1p, b1p, w2p, g2p, b2p, w3p, g3p, b3p)


# ------------------------- pure-JAX reference (NCHW) ------------------------
def reference_forward(x, w1_t, w2_t, w3_t, g1, b1, g2, b2, g3, b3):
    dn = ('NCHW', 'OIHW', 'NCHW')

    def bn(y, g, b):
        mu = jnp.mean(y, axis=(0, 2, 3), keepdims=True)
        var = jnp.mean((y - mu) ** 2, axis=(0, 2, 3), keepdims=True)
        return ((y - mu) * lax.rsqrt(var + EPS) * g.reshape(1, -1, 1, 1)
                + b.reshape(1, -1, 1, 1))

    out = lax.conv_general_dilated(x, w1_t, (1, 1), 'VALID', dimension_numbers=dn)
    out = jnp.maximum(bn(out, g1, b1), 0.0)
    out = lax.conv_general_dilated(out, w2_t, (1, 1), ((1, 1), (1, 1)),
                                   dimension_numbers=dn)
    out = jnp.maximum(bn(out, g2, b2), 0.0)
    out = lax.conv_general_dilated(out, w3_t, (1, 1), 'VALID', dimension_numbers=dn)
    out = bn(out, g3, b3)
    return jnp.maximum(out + x, 0.0)


if __name__ == "__main__":
    key = jax.random.PRNGKey(0)
    ks = jax.random.split(key, 10)

    # PyTorch-shaped conv weights (OIHW), bias=False
    w1_t = jax.random.normal(ks[0], (WIDTH, INPLANES, 1, 1), jnp.float32) * 0.2
    w2_t = jax.random.normal(ks[1], (WIDTH, WIDTH, 3, 3), jnp.float32) * 0.2
    w3_t = jax.random.normal(ks[2], (COUT, WIDTH, 1, 1), jnp.float32) * 0.2

    # BatchNorm affine params (gamma, beta) per layer
    g1 = 1.0 + 0.1 * jax.random.normal(ks[3], (WIDTH,), jnp.float32)
    b1 = 0.1 * jax.random.normal(ks[4], (WIDTH,), jnp.float32)
    g2 = 1.0 + 0.1 * jax.random.normal(ks[5], (WIDTH,), jnp.float32)
    b2 = 0.1 * jax.random.normal(ks[6], (WIDTH,), jnp.float32)
    g3 = 1.0 + 0.1 * jax.random.normal(ks[7], (COUT,), jnp.float32)
    b3 = 0.1 * jax.random.normal(ks[8], (COUT,), jnp.float32)

    params = pack_params(w1_t, w2_t, w3_t, g1, b1, g2, b2, g3, b3)

    x = jax.random.normal(ks[9], (N, INPLANES, H, W), jnp.float32)

    # TODO(synk): BatchNorm2d running_mean/running_var updates are not modeled
    # (only the training-mode forward output is produced, like the reference).
    out = jax.block_until_ready(bottleneck_forward(x, params))
    ref = jax.block_until_ready(
        reference_forward(x, w1_t, w2_t, w3_t, g1, b1, g2, b2, g3, b3))

    assert out.shape == (N, COUT, H, W)
    assert jnp.allclose(out, ref, atol=1e-4, rtol=1e-4), \
        f"max abs err {jnp.max(jnp.abs(out - ref))}"
    print("KERNEL_OK")
</pallas_src>

<mosaic_0001>
module attributes {stable_mosaic.version = 11 : i64} {
  func.func @bottleneck_kernel(%arg0: memref<2x16x64xf32, #tpu.memory_space<vmem>>, %arg1: memref<8x16xf32, #tpu.memory_space<vmem>>, %arg2: memref<8x1xf32, #tpu.memory_space<vmem>>, %arg3: memref<8x1xf32, #tpu.memory_space<vmem>>, %arg4: memref<8x72xf32, #tpu.memory_space<vmem>>, %arg5: memref<8x1xf32, #tpu.memory_space<vmem>>, %arg6: memref<8x1xf32, #tpu.memory_space<vmem>>, %arg7: memref<16x8xf32, #tpu.memory_space<vmem>>, %arg8: memref<16x1xf32, #tpu.memory_space<vmem>>, %arg9: memref<16x1xf32, #tpu.memory_space<vmem>>, %arg10: memref<2x16x64xf32, #tpu.memory_space<vmem>>) attributes {dimension_semantics = [], scalar_prefetch = 0 : i64, scratch_operands = 0 : i64, tpu.core_type = #tpu.core_type<tc>} {
    %c0 = arith.constant 0 : index
    %c0_0 = arith.constant 0 : index
    %c0_1 = arith.constant 0 : index
    %0 = vector.load %arg0[%c0, %c0_0, %c0_1] : memref<2x16x64xf32, #tpu.memory_space<vmem>>, vector<1x16x64xf32>
    %1 = vector.shape_cast %0 : vector<1x16x64xf32> to vector<16x64xf32>
    %c1 = arith.constant 1 : index
    %c0_2 = arith.constant 0 : index
    %c0_3 = arith.constant 0 : index
    %2 = vector.load %arg0[%c1, %c0_2, %c0_3] : memref<2x16x64xf32, #tpu.memory_space<vmem>>, vector<1x16x64xf32>
    %3 = vector.shape_cast %2 : vector<1x16x64xf32> to vector<16x64xf32>
    %4 = tpu.concatenate %1, %3 in 1 : vector<16x64xf32>, vector<16x64xf32> -> vector<16x128xf32>
    %c0_4 = arith.constant 0 : index
    %c0_5 = arith.constant 0 : index
    %5 = vector.load %arg1[%c0_4, %c0_5] : memref<8x16xf32, #tpu.memory_space<vmem>>, vector<8x16xf32>
    %cst = arith.constant dense<0.000000e+00> : vector<8x128xf32>
    %6 = tpu.matmul %5, %4, %cst {dimension_numbers = #tpu.dot_dimension_numbers<[1], [0], [0], [1], [0, 0, 1, 1], [], []>} : vector<8x16xf32>, vector<16x128xf32>, vector<8x128xf32> -> vector<8x128xf32>
    %c0_6 = arith.constant 0 : index
    %c0_7 = arith.constant 0 : index
    %7 = vector.load %arg2[%c0_6, %c0_7] : memref<8x1xf32, #tpu.memory_space<vmem>>, vector<8x1xf32>
    %c0_8 = arith.constant 0 : index
    %c0_9 = arith.constant 0 : index
    %8 = vector.load %arg3[%c0_8, %c0_9] : memref<8x1xf32, #tpu.memory_space<vmem>>, vector<8x1xf32>
    %cst_10 = arith.constant dense<0.000000e+00> : vector<8xf32>
    %9 = vector.multi_reduction <add>, %6, %cst_10 [1] : vector<8x128xf32> to vector<8xf32>
    %10 = vector.shape_cast %9 : vector<8xf32> to vector<8x1xf32>
    %cst_11 = arith.constant 1.280000e+02 : f32
    %11 = vector.broadcast %cst_11 : f32 to vector<8x1xf32>
    %12 = arith.divf %10, %11 : vector<8x1xf32>
    %13 = vector.broadcast %12 : vector<8x1xf32> to vector<8x128xf32>
    %14 = arith.subf %6, %13 : vector<8x128xf32>
    %15 = arith.mulf %14, %14 : vector<8x128xf32>
    %cst_12 = arith.constant dense<0.000000e+00> : vector<8xf32>
    %16 = vector.multi_reduction <add>, %15, %cst_12 [1] : vector<8x128xf32> to vector<8xf32>
    %17 = vector.shape_cast %16 : vector<8xf32> to vector<8x1xf32>
    %cst_13 = arith.constant 1.280000e+02 : f32
    %18 = vector.broadcast %cst_13 : f32 to vector<8x1xf32>
    %19 = arith.divf %17, %18 : vector<8x1xf32>
    %cst_14 = arith.constant 9.99999974E-6 : f32
    %20 = vector.broadcast %cst_14 : f32 to vector<8x1xf32>
    %21 = arith.addf %19, %20 : vector<8x1xf32>
    %22 = math.rsqrt %21 : vector<8x1xf32>
    %23 = arith.mulf %7, %22 : vector<8x1xf32>
    %24 = arith.mulf %12, %23 : vector<8x1xf32>
    %25 = arith.subf %8, %24 : vector<8x1xf32>
    %26 = vector.broadcast %23 : vector<8x1xf32> to vector<8x128xf32>
    %27 = arith.mulf %6, %26 : vector<8x128xf32>
    %28 = vector.broadcast %25 : vector<8x1xf32> to vector<8x128xf32>
    %29 = arith.addf %27, %28 : vector<8x128xf32>
    %cst_15 = arith.constant 0.000000e+00 : f32
    %30 = vector.broadcast %cst_15 : f32 to vector<8x128xf32>
    %31 = arith.maximumf %29, %30 : vector<8x128xf32>
    %32 = tpu.iota {dimensions = array<i32: 1>} : vector<1x128xi32>
    %c7_i32 = arith.constant 7 : i32
    %33 = vector.broadcast %c7_i32 : i32 to vector<1x128xi32>
    %34 = arith.andi %32, %33 : vector<1x128xi32>
    %c3_i32 = arith.constant 3 : i32
    %35 = vector.broadcast %c3_i32 : i32 to vector<1x128xi32>
    %36 = arith.shrsi %32, %35 : vector<1x128xi32>
    %c7_i32_16 = arith.constant 7 : i32
    %37 = vector.broadcast %c7_i32_16 : i32 to vector<1x128xi32>
    %38 = arith.andi %36, %37 : vector<1x128xi32>
    %c1_i32 = arith.constant 1 : i32
    %39 = vector.broadcast %c1_i32 : i32 to vector<1x128xi32>
    %40 = arith.cmpi sge, %38, %39 : vector<1x128xi32>
    %c6_i32 = arith.constant 6 : i32
    %41 = vector.broadcast %c6_i32 : i32 to vector<1x128xi32>
    %42 = arith.cmpi sle, %38, %41 : vector<1x128xi32>
    %c1_i32_17 = arith.constant 1 : i32
    %43 = vector.broadcast %c1_i32_17 : i32 to vector<1x128xi32>
    %44 = arith.cmpi sge, %34, %43 : vector<1x128xi32>
    %c6_i32_18 = arith.constant 6 : i32
    %45 = vector.broadcast %c6_i32_18 : i32 to vector<1x128xi32>
    %46 = arith.cmpi sle, %34, %45 : vector<1x128xi32>
    %c9_i32 = arith.constant 9 : i32
    %47 = tpu.dynamic_rotate %31 by %c9_i32 dim 1 : vector<8x128xf32>, i32 -> vector<8x128xf32>
    %48 = arith.andi %40, %44 : vector<1x128xi1>
    %cst_19 = arith.constant 0.000000e+00 : f32
    %49 = vector.shape_cast %48 : vector<1x128xi1> to vector<1x128xi1>
    %50 = vector.broadcast %49 : vector<1x128xi1> to vector<8x128xi1>
    %51 = vector.broadcast %cst_19 : f32 to vector<8x128xf32>
    %52 = arith.select %50, %47, %51 : vector<8x128xi1>, vector<8x128xf32>
    %c8_i32 = arith.constant 8 : i32
    %53 = tpu.dynamic_rotate %31 by %c8_i32 dim 1 : vector<8x128xf32>, i32 -> vector<8x128xf32>
    %cst_20 = arith.constant 0.000000e+00 : f32
    %54 = vector.shape_cast %40 : vector<1x128xi1> to vector<1x128xi1>
    %55 = vector.broadcast %54 : vector<1x128xi1> to vector<8x128xi1>
    %56 = vector.broadcast %cst_20 : f32 to vector<8x128xf32>
    %57 = arith.select %55, %53, %56 : vector<8x128xi1>, vector<8x128xf32>
    %c7_i32_21 = arith.constant 7 : i32
    %58 = tpu.dynamic_rotate %31 by %c7_i32_21 dim 1 : vector<8x128xf32>, i32 -> vector<8x128xf32>
    %59 = arith.andi %40, %46 : vector<1x128xi1>
    %cst_22 = arith.constant 0.000000e+00 : f32
    %60 = vector.shape_cast %59 : vector<1x128xi1> to vector<1x128xi1>
    %61 = vector.broadcast %60 : vector<1x128xi1> to vector<8x128xi1>
    %62 = vector.broadcast %cst_22 : f32 to vector<8x128xf32>
    %63 = arith.select %61, %58, %62 : vector<8x128xi1>, vector<8x128xf32>
    %c1_i32_23 = arith.constant 1 : i32
    %64 = tpu.dynamic_rotate %31 by %c1_i32_23 dim 1 : vector<8x128xf32>, i32 -> vector<8x128xf32>
    %cst_24 = arith.constant 0.000000e+00 : f32
    %65 = vector.shape_cast %44 : vector<1x128xi1> to vector<1x128xi1>
    %66 = vector.broadcast %65 : vector<1x128xi1> to vector<8x128xi1>
    %67 = vector.broadcast %cst_24 : f32 to vector<8x128xf32>
    %68 = arith.select %66, %64, %67 : vector<8x128xi1>, vector<8x128xf32>
    %c127_i32 = arith.constant 127 : i32
    %69 = tpu.dynamic_rotate %31 by %c127_i32 dim 1 : vector<8x128xf32>, i32 -> vector<8x128xf32>
    %cst_25 = arith.constant 0.000000e+00 : f32
    %70 = vector.shape_cast %46 : vector<1x128xi1> to vector<1x128xi1>
    %71 = vector.broadcast %70 : vector<1x128xi1> to vector<8x128xi1>
    %72 = vector.broadcast %cst_25 : f32 to vector<8x128xf32>
    %73 = arith.select %71, %69, %72 : vector<8x128xi1>, vector<8x128xf32>
    %c121_i32 = arith.constant 121 : i32
    %74 = tpu.dynamic_rotate %31 by %c121_i32 dim 1 : vector<8x128xf32>, i32 -> vector<8x128xf32>
    %75 = arith.andi %42, %44 : vector<1x128xi1>
    %cst_26 = arith.constant 0.000000e+00 : f32
    %76 = vector.shape_cast %75 : vector<1x128xi1> to vector<1x128xi1>
    %77 = vector.broadcast %76 : vector<1x128xi1> to vector<8x128xi1>
    %78 = vector.broadcast %cst_26 : f32 to vector<8x128xf32>
    %79 = arith.select %77, %74, %78 : vector<8x128xi1>, vector<8x128xf32>
    %c120_i32 = arith.constant 120 : i32
    %80 = tpu.dynamic_rotate %31 by %c120_i32 dim 1 : vector<8x128xf32>, i32 -> vector<8x128xf32>
    %cst_27 = arith.constant 0.000000e+00 : f32
    %81 = vector.shape_cast %42 : vector<1x128xi1> to vector<1x128xi1>
    %82 = vector.broadcast %81 : vector<1x128xi1> to vector<8x128xi1>
    %83 = vector.broadcast %cst_27 : f32 to vector<8x128xf32>
    %84 = arith.select %82, %80, %83 : vector<8x128xi1>, vector<8x128xf32>
    %c119_i32 = arith.constant 119 : i32
    %85 = tpu.dynamic_rotate %31 by %c119_i32 dim 1 : vector<8x128xf32>, i32 -> vector<8x128xf32>
    %86 = arith.andi %42, %46 : vector<1x128xi1>
    %cst_28 = arith.constant 0.000000e+00 : f32
    %87 = vector.shape_cast %86 : vector<1x128xi1> to vector<1x128xi1>
    %88 = vector.broadcast %87 : vector<1x128xi1> to vector<8x128xi1>
    %89 = vector.broadcast %cst_28 : f32 to vector<8x128xf32>
    %90 = arith.select %88, %85, %89 : vector<8x128xi1>, vector<8x128xf32>
    %91 = tpu.concatenate %52, %57, %63, %68, %31, %73, %79, %84, %90 in 0 : vector<8x128xf32>, vector<8x128xf32>, vector<8x128xf32>, vector<8x128xf32>, vector<8x128xf32>, vector<8x128xf32>, vector<8x128xf32>, vector<8x128xf32>, vector<8x128xf32> -> vector<72x128xf32>
    %c0_29 = arith.constant 0 : index
    %c0_30 = arith.constant 0 : index
    %92 = vector.load %arg4[%c0_29, %c0_30] : memref<8x72xf32, #tpu.memory_space<vmem>>, vector<8x72xf32>
    %cst_31 = arith.constant dense<0.000000e+00> : vector<8x128xf32>
    %93 = tpu.matmul %92, %91, %cst_31 {dimension_numbers = #tpu.dot_dimension_numbers<[1], [0], [0], [1], [0, 0, 1, 1], [], []>} : vector<8x72xf32>, vector<72x128xf32>, vector<8x128xf32> -> vector<8x128xf32>
    %c0_32 = arith.constant 0 : index
    %c0_33 = arith.constant 0 : index
    %94 = vector.load %arg5[%c0_32, %c0_33] : memref<8x1xf32, #tpu.memory_space<vmem>>, vector<8x1xf32>
    %c0_34 = arith.constant 0 : index
    %c0_35 = arith.constant 0 : index
    %95 = vector.load %arg6[%c0_34, %c0_35] : memref<8x1xf32, #tpu.memory_space<vmem>>, vector<8x1xf32>
    %cst_36 = arith.constant dense<0.000000e+00> : vector<8xf32>
    %96 = vector.multi_reduction <add>, %93, %cst_36 [1] : vector<8x128xf32> to vector<8xf32>
    %97 = vector.shape_cast %96 : vector<8xf32> to vector<8x1xf32>
    %cst_37 = arith.constant 1.280000e+02 : f32
    %98 = vector.broadcast %cst_37 : f32 to vector<8x1xf32>
    %99 = arith.divf %97, %98 : vector<8x1xf32>
    %100 = vector.broadcast %99 : vector<8x1xf32> to vector<8x128xf32>
    %101 = arith.subf %93, %100 : vector<8x128xf32>
    %102 = arith.mulf %101, %101 : vector<8x128xf32>
    %cst_38 = arith.constant dense<0.000000e+00> : vector<8xf32>
    %103 = vector.multi_reduction <add>, %102, %cst_38 [1] : vector<8x128xf32> to vector<8xf32>
    %104 = vector.shape_cast %103 : vector<8xf32> to vector<8x1xf32>
    %cst_39 = arith.constant 1.280000e+02 : f32
    %105 = vector.broadcast %cst_39 : f32 to vector<8x1xf32>
    %106 = arith.divf %104, %105 : vector<8x1xf32>
    %cst_40 = arith.constant 9.99999974E-6 : f32
    %107 = vector.broadcast %cst_40 : f32 to vector<8x1xf32>
    %108 = arith.addf %106, %107 : vector<8x1xf32>
    %109 = math.rsqrt %108 : vector<8x1xf32>
    %110 = arith.mulf %94, %109 : vector<8x1xf32>
    %111 = arith.mulf %99, %110 : vector<8x1xf32>
    %112 = arith.subf %95, %111 : vector<8x1xf32>
    %113 = vector.broadcast %110 : vector<8x1xf32> to vector<8x128xf32>
    %114 = arith.mulf %93, %113 : vector<8x128xf32>
    %115 = vector.broadcast %112 : vector<8x1xf32> to vector<8x128xf32>
    %116 = arith.addf %114, %115 : vector<8x128xf32>
    %cst_41 = arith.constant 0.000000e+00 : f32
    %117 = vector.broadcast %cst_41 : f32 to vector<8x128xf32>
    %118 = arith.maximumf %116, %117 : vector<8x128xf32>
    %c0_42 = arith.constant 0 : index
    %c0_43 = arith.constant 0 : index
    %119 = vector.load %arg7[%c0_42, %c0_43] : memref<16x8xf32, #tpu.memory_space<vmem>>, vector<16x8xf32>
    %cst_44 = arith.constant dense<0.000000e+00> : vector<16x128xf32>
    %120 = tpu.matmul %119, %118, %cst_44 {dimension_numbers = #tpu.dot_dimension_numbers<[1], [0], [0], [1], [0, 0, 1, 1], [], []>} : vector<16x8xf32>, vector<8x128xf32>, vector<16x128xf32> -> vector<16x128xf32>
    %c0_45 = arith.constant 0 : index
    %c0_46 = arith.constant 0 : index
    %121 = vector.load %arg8[%c0_45, %c0_46] : memref<16x1xf32, #tpu.memory_space<vmem>>, vector<16x1xf32>
    %c0_47 = arith.constant 0 : index
    %c0_48 = arith.constant 0 : index
    %122 = vector.load %arg9[%c0_47, %c0_48] : memref<16x1xf32, #tpu.memory_space<vmem>>, vector<16x1xf32>
    %cst_49 = arith.constant dense<0.000000e+00> : vector<16xf32>
    %123 = vector.multi_reduction <add>, %120, %cst_49 [1] : vector<16x128xf32> to vector<16xf32>
    %124 = vector.shape_cast %123 : vector<16xf32> to vector<16x1xf32>
    %cst_50 = arith.constant 1.280000e+02 : f32
    %125 = vector.broadcast %cst_50 : f32 to vector<16x1xf32>
    %126 = arith.divf %124, %125 : vector<16x1xf32>
    %127 = vector.broadcast %126 : vector<16x1xf32> to vector<16x128xf32>
    %128 = arith.subf %120, %127 : vector<16x128xf32>
    %129 = arith.mulf %128, %128 : vector<16x128xf32>
    %cst_51 = arith.constant dense<0.000000e+00> : vector<16xf32>
    %130 = vector.multi_reduction <add>, %129, %cst_51 [1] : vector<16x128xf32> to vector<16xf32>
    %131 = vector.shape_cast %130 : vector<16xf32> to vector<16x1xf32>
    %cst_52 = arith.constant 1.280000e+02 : f32
    %132 = vector.broadcast %cst_52 : f32 to vector<16x1xf32>
    %133 = arith.divf %131, %132 : vector<16x1xf32>
    %cst_53 = arith.constant 9.99999974E-6 : f32
    %134 = vector.broadcast %cst_53 : f32 to vector<16x1xf32>
    %135 = arith.addf %133, %134 : vector<16x1xf32>
    %136 = math.rsqrt %135 : vector<16x1xf32>
    %137 = arith.mulf %121, %136 : vector<16x1xf32>
    %138 = arith.mulf %126, %137 : vector<16x1xf32>
    %139 = arith.subf %122, %138 : vector<16x1xf32>
    %140 = vector.broadcast %137 : vector<16x1xf32> to vector<16x128xf32>
    %141 = arith.mulf %120, %140 : vector<16x128xf32>
    %142 = vector.broadcast %139 : vector<16x1xf32> to vector<16x128xf32>
    %143 = arith.addf %141, %142 : vector<16x128xf32>
    %144 = arith.addf %143, %4 : vector<16x128xf32>
    %cst_54 = arith.constant 0.000000e+00 : f32
    %145 = vector.broadcast %cst_54 : f32 to vector<16x128xf32>
    %146 = arith.maximumf %144, %145 : vector<16x128xf32>
    %147 = vector.extract_strided_slice %146 {offsets = [0, 0], sizes = [16, 64], strides = [1, 1]} : vector<16x128xf32> to vector<16x64xf32>
    %c0_55 = arith.constant 0 : index
    %c0_56 = arith.constant 0 : index
    %c0_57 = arith.constant 0 : index
    %148 = vector.load %arg10[%c0_55, %c0_56, %c0_57] : memref<2x16x64xf32, #tpu.memory_space<vmem>>, vector<1x16x64xf32>
    %149 = vector.shape_cast %148 : vector<1x16x64xf32> to vector<16x64xf32>
    %150 = vector.shape_cast %147 : vector<16x64xf32> to vector<1x16x64xf32>
    tpu.vector_store %arg10[%c0_55, %c0_56, %c0_57], %150 {strides = array<i32>} : memref<2x16x64xf32, #tpu.memory_space<vmem>>, vector<1x16x64xf32>,
    %151 = vector.extract_strided_slice %146 {offsets = [0, 64], sizes = [16, 64], strides = [1, 1]} : vector<16x128xf32> to vector<16x64xf32>
    %c1_58 = arith.constant 1 : index
    %c0_59 = arith.constant 0 : index
    %c0_60 = arith.constant 0 : index
    %152 = vector.load %arg10[%c1_58, %c0_59, %c0_60] : memref<2x16x64xf32, #tpu.memory_space<vmem>>, vector<1x16x64xf32>
    %153 = vector.shape_cast %152 : vector<1x16x64xf32> to vector<16x64xf32>
    %154 = vector.shape_cast %151 : vector<16x64xf32> to vector<1x16x64xf32>
    tpu.vector_store %arg10[%c1_58, %c0_59, %c0_60], %154 {strides = array<i32>} : memref<2x16x64xf32, #tpu.memory_space<vmem>>, vector<1x16x64xf32>,
    return
  }
}

</mosaic_0001>

<bundles_post_ra>
// kernel: tpu_custom_call.1
= control target key start
LH: loop header
LB: loop body
LE: loop exit
PB: predicated region body
PF: predicated region fallthrough
CT: control target
= control target key end

     0   :  { %s610_s0 = inlined_call_operand.vmem [shape: f32[2,16,64], index: 0, kind: input, shape index: {}]   ;;  %s611_s1 = inlined_call_operand.vmem [shape: f32[8,16], index: 1, kind: input, shape index: {}]   ;;  %s612_s2 = inlined_call_operand.vmem [shape: f32[8,1], index: 2, kind: input, shape index: {}]   ;;  %s613_s3 = inlined_call_operand.vmem [shape: f32[8,1], index: 3, kind: input, shape index: {}]   ;;  %s614_s4 = inlined_call_operand.vmem [shape: f32[8,72], index: 4, kind: input, shape index: {}]   ;;  %s615_s5 = inlined_call_operand.vmem [shape: f32[8,1], index: 5, kind: input, shape index: {}]   ;;  %s616_s6 = inlined_call_operand.vmem [shape: f32[8,1], index: 6, kind: input, shape index: {}]   ;;  %s617_s7 = inlined_call_operand.vmem [shape: f32[16,8], index: 7, kind: input, shape index: {}]   ;;  %s618_s8 = inlined_call_operand.vmem [shape: f32[16,1], index: 8, kind: input, shape index: {}]   ;;  %s619_s9 = inlined_call_operand.vmem [shape: f32[16,1], index: 9, kind: input, shape index: {}]   ;;  %s620_s10 = inlined_call_operand.hbm [shape: f32[2,16,64], index: 10, kind: output, shape index: {}]  }
   0x1   :  { %v376_v0 = vld [vmem:[%s610_s0 + $0x18] sm:$0xff] }
   0x2   :  { %15 = vsyncpa [#allocation3], 0  ;;  %s441_s15 = smov 64   ;;  %v375_v1 = vld [vmem:[%s610_s0 + $0x10] sm:$0xff]  ;;  %v37_v2 = vld [vmem:[%s610_s0 + $0x8] sm:$0xff]  ;;  %vm49_vm0 = vcmask 523264   ;;  %v121_v42 = vlaneseq }
   0x3   :  { %45 = vrot.lane.b32.xlu0 %v376_v0, %s441_s15  ;;  %v36_v5 = vld [vmem:[%s610_s0] sm:$0xff]  ;;  %vm53_vm1 = vcmask 130048   ;;  %v442_v10 = vmov 128.0   ;;  %v443_v21 = vmov 0   ;;  %s444_s26 = smov 121   ;;  %s446_s27 = smov 119  }
   0x4   :  { %v52_v7 = vld [vmem:[%s611_s1] sm:$0xff]  ;;  %405 = vrcp.f32 %v442_v10  ;;  %402 = vset.pattern.permute.xlu2 %v443_v21  ;;  %403 = vset.pattern.permute.xlu0 %v443_v21  ;;  %s447_s28 = smov 1   ;;  %s448_s29 = smov 127   ;;  %v122_v43 = vand.u32 127, %v121_v42  ;;  %vm175_vm14 = vcmask 588800  }
   0x5   :  { %404 = vset.pattern.permute.xlu1 %v443_v21  ;;  %v77_v30 = vld [vmem:[%s612_s2] sm:$0xff]  ;;  %s445_s2 = smov 120   ;;  %s449_s30 = smov 8  }
   0x6   :  { %v78_v35 = vld [vmem:[%s613_s3] sm:$0xff]  ;;  %s450_s3 = smov 7   ;;  %s451_s11 = smov 9   ;;  %v124_v44 = vshra.s32 %v122_v43, 3  ;;  %v123_v45 = vand.u32 7, %v122_v43 }
   0x7   :  { %v174_v56 = vld [vmem:[%s614_s4] sm:$0xff] }
   0x8   :  { %v125_v46 = vand.u32 7, %v124_v44  ;;  %vm545_vm7 = vcmp.le.s32.totalorder %v123_v45, 6  ;;  %vm551_vm9 = vcmp.ge.s32.totalorder %v123_v45, 1  ;;  %v268_v47 = vld [vmem:[%s618_s8] sm:$0xff] }
   0xa   :  { %v406_v11 = vpop.eup %405  ;;  %vm127_vm6 = vcmp.le.s32.totalorder %v125_v46, 6  ;;  %vm126_vm11 = vcmp.ge.s32.totalorder %v125_v46, 1 }
   0xb   :  { %43 = vrot.lane.b32.xlu0 %v375_v1, %s441_s15  ;;  %v82_v12 = vmul.f32 128.0, %v406_v11  ;;  %vm86_vm2 = vweird.f32 %v406_v11  ;;  %vm170_vm8 = vmand %vm127_vm6, %vm545_vm7 }
   0xc   :  { %vm159_vm10 = vmand %vm127_vm6, %vm551_vm9 }
   0xd   :  { %v83_v13 = vsub.f32 1.0, %v82_v12  ;;  %vm143_vm12 = vmand %vm126_vm11, %vm545_vm7 }
   0xe   :  { %vm132_vm13 = vmand %vm126_vm11, %vm551_vm9 }
   0xf   :  { %v84_v14 = vmul.f32 %v406_v11, %v83_v13 }
  0x11   :  { %v85_v15 = vadd.f32 %v406_v11, %v84_v14  ;;  %v200_v14 = vld [vmem:[%s616_s6] sm:$0xff] }
  0x13   :  { %v534_v16 = vsel %vm86_vm2, %v406_v11, %v85_v15 }
  0x75   :  { %v46_v3 = vpop.permute.xlu0 %45 }
  0x76   :  { %v521_v4 = vsel %vm49_vm0, %v37_v2, %v46_v3 }
  0x77   :  { %71 = vmatpush.msra.mxu0 %v521_v4 }
  0x7d   :  { %v44_v6 = vpop.permute.xlu0 %43 }
  0x7e   :  { %v531_v8 = vsel %vm49_vm0, %v36_v5, %v44_v6 }
  0x7f   :  { %72 = vmatpush.msra.mxu0 %v531_v8 }
  0x80   :  { %377 = vmatmul.msk.f32.vlgmr.msra.gmra.mxu0 %vm53_vm1, %v52_v7 }
  0xfd   :  { %v74_v9 = vpop.f32.mrf.mxu0 }
  0xfe   :  { %79 = vadd.xlane.f32.xlu1 %v74_v9 }
 0x171   :  { %v80_v17 = vpop.xlane.xlu1 %79 }
 0x172   :  { %v88_v18 = vmul.f32 %v534_v16, %v80_v17 }
 0x174   :  { %v89_v19 = vsub.f32 %v74_v9, %v88_v18 }
 0x176   :  { %v90_v20 = vmul.f32 %v89_v19, %v89_v19 }
 0x178   :  { %91 = vadd.xlane.f32.xlu1 %v90_v20 }
 0x1eb   :  { %v92_v22 = vpop.xlane.xlu1 %91 }
 0x1ec   :  { %v93_v23 = vmul.f32 %v92_v22, %v534_v16  ;;  %v236_v22 = vld [vmem:[%s617_s7] sm:$0xff] }
 0x1ee   :  { %v94_v24 = vadd.f32 1e-05, %v93_v23  ;;  %v237_v23 = vld [vmem:[%s617_s7 + $0x8] sm:$0xff] }
 0x1f0   :  { %407 = vrsqrt.f32 %v94_v24  ;;  %vm101_vm4 = vweird.f32 %v94_v24 }
 0x1f6   :  { %v408_v25 = vpop.eup %407 }
 0x1f7   :  { %v96_v26 = vmul.f32 %v408_v25, %v94_v24  ;;  %vm102_vm3 = vweird.f32 %v408_v25 }
 0x1f8   :  { %vm103_vm5 = vmor %vm101_vm4, %vm102_vm3  ;;  %vm238_vm3 = vcmask 64512  }
 0x1f9   :  { %v97_v27 = vmul.f32 %v408_v25, %v96_v26 }
 0x1fb   :  { %v98_v28 = vmul.f32 0.5, %v97_v27 }
 0x1fd   :  { %v99_v29 = vsub.f32 1.5, %v98_v28 }
 0x1ff   :  { %v100_v31 = vmul.f32 %v408_v25, %v99_v29 }
 0x201   :  { %v104_v32 = vsel %vm103_vm5, %v408_v25, %v100_v31 }
 0x202   :  { %v105_v33 = vmul.f32 %v104_v32, %v77_v30 }
 0x204   :  { %110 = vperm.xlu2 %402, %v105_v33   ;;  %v106_v34 = vmul.f32 %v105_v33, %v88_v18 }
 0x206   :  { %v107_v36 = vsub.f32 %v78_v35, %v106_v34 }
 0x20c   :  { %116 = vperm.xlu2 %402, %v107_v36  }
 0x25e   :  { %v111_v37 = vpop.permute.xlu2 %110 }
 0x25f   :  { %v113_v38 = vmul.f32 %v111_v37, %v74_v9  ;;  %v199_v9 = vld [vmem:[%s615_s5] sm:$0xff] }
 0x266   :  { %v117_v39 = vpop.permute.xlu2 %116 }
 0x267   :  { %v119_v40 = vadd.f32 %v117_v39, %v113_v38 }
 0x269   :  { %v120_v41 = vmax.f32 %v119_v40, 0.0 }
 0x26b   :  { %157 = vrot.lane.b32.xlu2 %v120_v41, %s444_s26  ;;  %163 = vrot.lane.b32.xlu1 %v120_v41, %s445_s2  ;;  %s363_s2 = sshll.u32 %s620_s10, 4  ;;  %s364_s2 = int_to_ptr.hbm [resolvable:$true] %s363_s2 }
 0x26c   :  { %168 = vrot.lane.b32.xlu0 %v120_v41, %s446_s27  ;;  %s453_s27 = smov 128  }
 0x273   :  { %147 = vrot.lane.b32.xlu2 %v120_v41, %s447_s28 }
 0x274   :  { %152 = vrot.lane.b32.xlu0 %v120_v41, %s448_s29 }
 0x27b   :  { %136 = vrot.lane.b32.xlu2 %v120_v41, %s449_s30 }
 0x27c   :  { %141 = vrot.lane.b32.xlu0 %v120_v41, %s450_s3 }
 0x284   :  { %130 = vrot.lane.b32.xlu0 %v120_v41, %s451_s11 }
 0x2c5   :  { %v158_v48 = vpop.permute.xlu2 %157 }
 0x2cd   :  { %v148_v52 = vpop.permute.xlu2 %147 }
 0x2d5   :  { %v137_v55 = vpop.permute.xlu2 %136 }
 0x2dd   :  { %v164_v51 = vpop.permute.xlu1 %163 }
 0x2de   :  { %v169_v50 = vpop.permute.xlu0 %168 }
 0x2df   :  { %378 = vmatpush.msk.msra.mxu1 %vm170_vm8, %v169_v50 }
 0x2e1   :  { %379 = vmatpush.msk.msra.mxu1 %vm127_vm6, %v164_v51 }
 0x2e3   :  { %380 = vmatpush.msk.msra.mxu1 %vm159_vm10, %v158_v48 }
 0x2e6   :  { %v153_v53 = vpop.permute.xlu0 %152 }
 0x2e7   :  { %381 = vmatpush.msk.msra.mxu1 %vm545_vm7, %v153_v53 }
 0x2e9   :  { %190 = vmatpush.msra.mxu1 %v120_v41 }
 0x2eb   :  { %382 = vmatpush.msk.msra.mxu1 %vm551_vm9, %v148_v52  ;;  %v270_v52 = vld [vmem:[%s619_s9] sm:$0xff] }
 0x2ee   :  { %v142_v54 = vpop.permute.xlu0 %141 }
 0x2ef   :  { %383 = vmatpush.msk.msra.mxu1 %vm143_vm12, %v142_v54 }
 0x2f1   :  { %384 = vmatpush.msk.msra.mxu1 %vm126_vm11, %v137_v55 }
 0x2f6   :  { %v131_v57 = vpop.permute.xlu0 %130 }
 0x2f7   :  { %385 = vmatpush.msk.msra.mxu1 %vm132_vm13, %v131_v57 }
 0x2f8   :  { %386 = vmatmul.msk.f32.vlgmr.msra.gmra.mxu1 %vm175_vm14, %v174_v56  ;;  %v269_v56 = vld [vmem:[%s618_s8 + $0x8] sm:$0xff]  ;;  %s452_s8 = smov [#allocation2]  }
 0x375   :  { %v196_v58 = vpop.f32.mrf.mxu1 }
 0x376   :  { %201 = vadd.xlane.f32.xlu2 %v196_v58 }
 0x3e9   :  { %v202_v59 = vpop.xlane.xlu2 %201 }
 0x3ea   :  { %v203_v60 = vmul.f32 %v202_v59, %v534_v16 }
 0x3ec   :  { %v204_v61 = vsub.f32 %v196_v58, %v203_v60 }
 0x3ee   :  { %v205_v62 = vmul.f32 %v204_v61, %v204_v61 }
 0x3f0   :  { %206 = vadd.xlane.f32.xlu1 %v205_v62 }
 0x463   :  { %v207_v63 = vpop.xlane.xlu1 %206 }
 0x464   :  { %v208_v0 = vmul.f32 %v207_v63, %v534_v16 }
 0x466   :  { %v209_v1 = vadd.f32 1e-05, %v208_v0 }
 0x468   :  { %409 = vrsqrt.f32 %v209_v1  ;;  %vm216_vm1 = vweird.f32 %v209_v1 }
 0x46e   :  { %v410_v2 = vpop.eup %409 }
 0x46f   :  { %v211_v3 = vmul.f32 %v410_v2, %v209_v1  ;;  %vm217_vm15 = vweird.f32 %v410_v2 }
 0x470   :  { %vm218_vm2 = vmor %vm216_vm1, %vm217_vm15 }
 0x471   :  { %v212_v5 = vmul.f32 %v410_v2, %v211_v3 }
 0x473   :  { %v213_v6 = vmul.f32 0.5, %v212_v5 }
 0x475   :  { %v214_v7 = vsub.f32 1.5, %v213_v6 }
 0x477   :  { %v215_v10 = vmul.f32 %v410_v2, %v214_v7 }
 0x479   :  { %v219_v11 = vsel %vm218_vm2, %v410_v2, %v215_v10 }
 0x47a   :  { %v220_v12 = vmul.f32 %v219_v11, %v199_v9 }
 0x47c   :  { %225 = vperm.xlu0 %403, %v220_v12   ;;  %v221_v13 = vmul.f32 %v220_v12, %v203_v60  ;;  %v271_v60 = vld [vmem:[%s619_s9 + $0x8] sm:$0xff]  ;;  %s361_s9 = sshll.u32 %s452_s8, 4  ;;  %s362_s9 = int_to_ptr.vmem [resolvable:$true] %s361_s9 }
 0x47e   :  { %v222_v15 = vsub.f32 %v200_v14, %v221_v13 }
 0x484   :  { %231 = vperm.xlu0 %403, %v222_v15  }
 0x4ee   :  { %v226_v17 = vpop.permute.xlu0 %225 }
 0x4ef   :  { %v228_v18 = vmul.f32 %v226_v17, %v196_v58 }
 0x4f6   :  { %v232_v19 = vpop.permute.xlu0 %231 }
 0x4f7   :  { %v234_v20 = vadd.f32 %v232_v19, %v228_v18 }
 0x4f9   :  { %v235_v21 = vmax.f32 %v234_v20, 0.0 }
 0x4fb   :  { %260 = vmatpush.msra.mxu2 %v235_v21 }
 0x4fc   :  { %387 = vmatmul.msk.f32.vlgmr.msra.gmra.mxu2 %vm238_vm3, %v236_v22 }
 0x504   :  { %388 = vmatmul.msk.f32.gmra.mxu2 %vm238_vm3, %v237_v23 }
 0x57f   :  { %v262_v24 = vpop.f32.mrf.mxu2 }
 0x580   :  { %272 = vadd.xlane.f32.xlu0 %v262_v24 }
 0x587   :  { %v265_v25 = vpop.f32.mrf.mxu2 }
 0x588   :  { %274 = vadd.xlane.f32.xlu2 %v265_v25 }
 0x5f3   :  { %v273_v26 = vpop.xlane.xlu0 %272 }
 0x5f4   :  { %v276_v27 = vmul.f32 %v273_v26, %v534_v16 }
 0x5f6   :  { %v278_v28 = vsub.f32 %v262_v24, %v276_v27 }
 0x5f8   :  { %v280_v29 = vmul.f32 %v278_v28, %v278_v28 }
 0x5fa   :  { %282 = vadd.xlane.f32.xlu1 %v280_v29 }
 0x5fb   :  { %v275_v30 = vpop.xlane.xlu2 %274 }
 0x5fc   :  { %v277_v31 = vmul.f32 %v275_v30, %v534_v16 }
 0x5fe   :  { %v279_v32 = vsub.f32 %v265_v25, %v277_v31 }
 0x600   :  { %v281_v33 = vmul.f32 %v279_v32, %v279_v32 }
 0x602   :  { %284 = vadd.xlane.f32.xlu2 %v281_v33 }
 0x66d   :  { %v283_v34 = vpop.xlane.xlu1 %282 }
 0x66e   :  { %v286_v35 = vmul.f32 %v283_v34, %v534_v16 }
 0x670   :  { %v288_v36 = vadd.f32 1e-05, %v286_v35 }
 0x672   :  { %411 = vrsqrt.f32 %v288_v36  ;;  %vm296_vm5 = vweird.f32 %v288_v36 }
 0x675   :  { %v285_v37 = vpop.xlane.xlu2 %284 }
 0x676   :  { %v287_v38 = vmul.f32 %v285_v37, %v534_v16 }
 0x678   :  { %v412_v39 = vpop.eup %411  ;;  %v289_v40 = vadd.f32 1e-05, %v287_v38 }
 0x679   :  { %v291_v41 = vmul.f32 %v412_v39, %v288_v36  ;;  %vm297_vm4 = vweird.f32 %v412_v39 }
 0x67a   :  { %413 = vrsqrt.f32 %v289_v40  ;;  %vm298_vm6 = vmor %vm296_vm5, %vm297_vm4  ;;  %vm306_vm8 = vweird.f32 %v289_v40 }
 0x67b   :  { %v292_v42 = vmul.f32 %v412_v39, %v291_v41 }
 0x67d   :  { %v293_v43 = vmul.f32 0.5, %v292_v42 }
 0x67f   :  { %v294_v44 = vsub.f32 1.5, %v293_v43 }
 0x680   :  { %v414_v45 = vpop.eup %413 }
 0x681   :  { %v301_v46 = vmul.f32 %v414_v45, %v289_v40  ;;  %v295_v48 = vmul.f32 %v412_v39, %v294_v44  ;;  %vm307_vm7 = vweird.f32 %v414_v45 }
 0x682   :  { %vm308_vm9 = vmor %vm306_vm8, %vm307_vm7 }
 0x683   :  { %v302_v49 = vmul.f32 %v414_v45, %v301_v46  ;;  %v299_v50 = vsel %vm298_vm6, %v412_v39, %v295_v48 }
 0x684   :  { %v310_v16 = vmul.f32 %v299_v50, %v268_v47 }
 0x685   :  { %v303_v51 = vmul.f32 0.5, %v302_v49 }
 0x686   :  { %318 = vperm.xlu1 %404, %v310_v16   ;;  %v312_v53 = vmul.f32 %v310_v16, %v276_v27 }
 0x687   :  { %v304_v54 = vsub.f32 1.5, %v303_v51 }
 0x688   :  { %v314_v55 = vsub.f32 %v270_v52, %v312_v53 }
 0x689   :  { %v305_v57 = vmul.f32 %v414_v45, %v304_v54 }
 0x68a   :  { %330 = vperm.xlu0 %403, %v314_v55  }
 0x68b   :  { %v309_v58 = vsel %vm308_vm9, %v414_v45, %v305_v57 }
 0x68c   :  { %v311_v59 = vmul.f32 %v309_v58, %v269_v56 }
 0x68e   :  { %323 = vperm.xlu2 %402, %v311_v59   ;;  %v313_v61 = vmul.f32 %v311_v59, %v277_v31 }
 0x690   :  { %v315_v62 = vsub.f32 %v271_v60, %v313_v61 }
 0x692   :  { %335 = vperm.xlu1 %404, %v315_v62  }
 0x6e8   :  { %v324_v5 = vpop.permute.xlu2 %323 }
 0x6e9   :  { %v327_v7 = vmul.f32 %v324_v5, %v265_v25 }
 0x6f8   :  { %v319_v63 = vpop.permute.xlu1 %318 }
 0x6f9   :  { %v326_v0 = vmul.f32 %v319_v63, %v262_v24 }
 0x6fc   :  { %v331_v1 = vpop.permute.xlu0 %330 }
 0x6fd   :  { %v338_v2 = vadd.f32 %v331_v1, %v326_v0 }
 0x6ff   :  { %v340_v3 = vadd.f32 %v338_v2, %v531_v8 }
 0x701   :  { %v342_v6 = vmax.f32 %v340_v3, 0.0 }
 0x703   :  { %344 = vst.msk [vmem:[#allocation2] sm:$0xff] %vm49_vm0, %v342_v6  ;;  %348 = vrot.lane.b32.xlu2 %v342_v6, %s441_s15 }
 0x704   :  { %v336_v9 = vpop.permute.xlu1 %335 }
 0x705   :  { %v339_v10 = vadd.f32 %v336_v9, %v327_v7 }
 0x707   :  { %v341_v11 = vadd.f32 %v339_v10, %v521_v4 }
 0x709   :  { %v343_v12 = vmax.f32 %v341_v11, 0.0 }
 0x70b   :  { %345 = vst.msk [vmem:[#allocation2 + $0x8] sm:$0xff] %vm49_vm0, %v343_v12  ;;  %350 = vrot.lane.b32.xlu1 %v343_v12, %s441_s15 }
 0x75d   :  { %v349_v13 = vpop.permute.xlu2 %348 }
 0x75e   :  { %355 = vst.msk [vmem:[#allocation2 + $0x10] sm:$0xff] %vm49_vm0, %v349_v13 }
 0x77d   :  { %v351_v8 = vpop.permute.xlu1 %350 }
 0x77e   :  { %356 = vst.msk [vmem:[#allocation2 + $0x18] sm:$0xff] %vm49_vm0, %v351_v8 }
 0x77f   :  { %369 = dma.vmem_to_hbm [thread:$0]  %s362_s9, 512, %s364_s2, [#allocation3], %s453_s27, %s453_s27, %s449_s30  }
 0x780   :  { %439 = dma.done.wait [#allocation3], 512  }
 0x781   :  { %440 = vsyncadd [#allocation3], 4294966784 }
 0x782   :  { %374 = vsyncpa [#allocation3], 1 }

</bundles_post_ra>
